<compile_context>
chip_gen: v7x
topology: tpu7x:2x2x1
jax: 0.10.0
libtpu: 0.0.40
codegen_flags: <defaults>
</compile_context>

<pallas_src>
import jax
import jax.numpy as jnp
from jax.experimental import pallas as pl
from jax.experimental.pallas import tpu as pltpu


# ----------------------------- Pallas kernel --------------------------------
def _make_fused_mlp_kernel(n_layers, use_bias):
    """Kernel computing the whole MLP for one (tm, nodes[0]) batch tile."""

    def kernel(*refs):
        x_ref = refs[0]
        w_refs = refs[1:1 + n_layers]
        b_refs = refs[1 + n_layers:1 + n_layers + (n_layers if use_bias else 0)]
        o_ref = refs[-1]

        h = x_ref[...]
        for l in range(n_layers):
            w = w_refs[l][...]
            # bf16 (or f32) operands, f32 accumulation on the MXU.
            acc = jnp.dot(h.astype(w.dtype), w, preferred_element_type=jnp.float32)
            h = jnp.tanh(acc)                                   # f32 epilogue (EUP slot; v5e-safe)
            if use_bias:
                h = h + b_refs[l][...]                          # f32 (1, N) bias, AFTER tanh
        o_ref[...] = h.astype(o_ref.dtype)

    return kernel


# --------------------------- PC_Model forward pass ---------------------------
def pc_model_forward(x, params, use_bias, *, block_m=256,
                     compute_dtype=jnp.bfloat16, out_dtype=jnp.float32):
    """PC_Model.forward: the whole layer chain fused into a single pallas_call.

    All weights stay resident in VMEM (single-buffered); intermediate activations never
    round-trip through HBM. Matmuls run with `compute_dtype` operands (default bf16 =
    MXU-native), accumulation and the tanh/bias epilogue stay in f32.

    On v5e prefer block_m=128 (matches the 128x128 MXU) and out_dtype=jnp.bfloat16 if the
    consumer accepts it (halves vst/writeback traffic).
    """
    M, K0 = x.shape
    n_layers = len(params)
    k_dims = [w.shape[0] for (w, _) in params]
    widths = [w.shape[1] for (w, _) in params]
    N_out = widths[-1]

    # --- batch tiling -------------------------------------------------------
    m_pad8 = pl.cdiv(M, 8) * 8
    tm = min(block_m, m_pad8)
    # v7x megacore: if the whole batch fits in one block_m tile but has more than one
    # sublane group, split it into (at least) 2 even tiles so the "parallel" grid axis
    # actually shards across the two TensorCores.
    if 8 < m_pad8 <= block_m:
        tm = pl.cdiv(pl.cdiv(m_pad8, 2), 8) * 8
    m_pad = pl.cdiv(m_pad8, tm) * tm

    x_c = x.astype(compute_dtype)
    x_p = x_c if m_pad == M else jnp.pad(x_c, ((0, m_pad - M), (0, 0)))

    # --- operands + BlockSpecs ----------------------------------------------
    in_specs = [pl.BlockSpec((tm, K0), lambda i: (i, 0))]       # pipelined batch tile
    operands = [x_p]
    w_list = [w.astype(compute_dtype) for (w, _) in params]
    for w in w_list:
        # Constant index_map -> no need for double buffering: single VMEM buffer.
        in_specs.append(pl.BlockSpec(w.shape, lambda i: (0, 0),
                                     pipeline_mode=pl.Buffered(1)))
        operands.append(w)
    if use_bias:
        for (_, b) in params:
            b2d = b.reshape(1, -1).astype(jnp.float32)          # lane-dense (1, N) f32 bias
            in_specs.append(pl.BlockSpec(b2d.shape, lambda i: (0, 0),
                                         pipeline_mode=pl.Buffered(1)))
            operands.append(b2d)
    # (when use_bias=False, no bias operands / DMA streams at all)

    # --- VMEM budget from per-BLOCK sizes (clamped for v7x's 64 MiB) ---------
    c_item = jnp.dtype(compute_dtype).itemsize
    o_item = jnp.dtype(out_dtype).itemsize
    x_blk_bytes = tm * K0 * c_item
    out_blk_bytes = tm * N_out * o_item
    w_bytes = sum(int(w.size) * c_item for w in w_list)                  # single-buffered
    b_bytes = (sum(widths) * 4) if use_bias else 0                       # single-buffered
    interm_bytes = 2 * tm * max(widths + [K0]) * 4                       # f32 live intermediates
    vmem_limit = (2 * x_blk_bytes + 2 * out_blk_bytes                    # double-buffered I/O
                  + w_bytes + b_bytes + interm_bytes + (4 << 20))        # + headroom
    vmem_limit = int(min(max(vmem_limit, 16 << 20), 56 << 20))

    # --- advisory cost estimate for XLA's scheduler ---------------------------
    flops = 2 * m_pad * sum(k * n for k, n in zip(k_dims, widths))
    transcendentals = m_pad * sum(widths)
    bytes_accessed = (int(x_p.size) * c_item + w_bytes + b_bytes
                      + m_pad * N_out * o_item)
    cost = pl.CostEstimate(flops=flops, transcendentals=transcendentals,
                           bytes_accessed=bytes_accessed)

    out = pl.pallas_call(
        _make_fused_mlp_kernel(n_layers, use_bias),
        out_shape=jax.ShapeDtypeStruct((m_pad, N_out), out_dtype),
        grid_spec=pltpu.PrefetchScalarGridSpec(
            num_scalar_prefetch=0,
            grid=(m_pad // tm,),                                 # batch tiles only; K collapsed
            in_specs=in_specs,
            out_specs=pl.BlockSpec((tm, N_out), lambda i: (i, 0)),
        ),
        compiler_params=pltpu.CompilerParams(
            dimension_semantics=("parallel",),                   # shards over TCs (v7x megacore)
            vmem_limit_bytes=vmem_limit,
        ),
        cost_estimate=cost,
    )(*operands)
    return out[:M]


def pc_model_forward_ref(val, params, use_bias):
    """Pure-JAX f32 reference with identical semantics (bias added AFTER tanh, per PC_Layer)."""
    val = val.astype(jnp.float32)
    for (w, b) in params:
        acc = jnp.dot(val, w.astype(jnp.float32), preferred_element_type=jnp.float32)
        val = jnp.tanh(acc)
        if use_bias:
            val = val + b.astype(jnp.float32)
    return val


def init_pc_model_params(key, nodes, std=0.05, dtype=jnp.float32):
    """Deterministic init matching PC_Layer.__init__: W ~ N(0, 0.05), b = 0."""
    params = []
    for l in range(len(nodes) - 1):
        key, wk = jax.random.split(key)
        w = (std * jax.random.normal(wk, (nodes[l], nodes[l + 1]))).astype(dtype)
        b = jnp.zeros((nodes[l + 1],), jnp.float32)
        params.append((w, b))
    return params


# ----------------------------------- main ------------------------------------
if __name__ == "__main__":
    # Small config consistent with the module: cf.nodes, cf.act_function=tanh, cf.use_bias=True.
    nodes = [256, 512, 256, 128]
    batch = 8

    key = jax.random.PRNGKey(0)
    key, xk = jax.random.split(key)
    x = jax.random.normal(xk, (batch, nodes[0]), dtype=jnp.float32)
    params = init_pc_model_params(key, nodes)

    ref = pc_model_forward_ref(x, params, use_bias=True)

    # --- default path: bf16 MXU operands, f32 accumulate + f32 epilogue ---
    out_bf = jax.block_until_ready(pc_model_forward(x, params, use_bias=True))
    assert out_bf.shape == (batch, nodes[-1])
    assert jnp.allclose(out_bf, ref, atol=3e-2, rtol=3e-2), "bf16-compute mismatch vs reference"

    # --- full-f32 path (tight tolerance) ---
    out_f32 = jax.block_until_ready(
        pc_model_forward(x, params, use_bias=True, compute_dtype=jnp.float32))
    assert jnp.allclose(out_f32, ref, atol=1e-5, rtol=1e-5), "f32 mismatch vs reference"

    # --- use_bias=False (bias operands dropped entirely) ---
    ref_nb = pc_model_forward_ref(x, params, use_bias=False)
    out_nb = jax.block_until_ready(
        pc_model_forward(x, params, use_bias=False, compute_dtype=jnp.float32))
    assert jnp.allclose(out_nb, ref_nb, atol=1e-5, rtol=1e-5), "no-bias mismatch vs reference"

    # --- non-multiple-of-8 batch exercises the padding path ---
    out_odd = jax.block_until_ready(
        pc_model_forward(x[:5], params, use_bias=True, compute_dtype=jnp.float32))
    assert jnp.allclose(out_odd, ref[:5], atol=1e-5, rtol=1e-5), "padded-batch mismatch"

    # --- medium batch exercises the >=2-tile split (v7x two-TC path) + padding ---
    key, xk2 = jax.random.split(key)
    x_med = jax.random.normal(xk2, (40, nodes[0]), dtype=jnp.float32)
    ref_med = pc_model_forward_ref(x_med, params, use_bias=True)
    out_med = jax.block_until_ready(pc_model_forward(x_med, params, use_bias=True))
    assert out_med.shape == (40, nodes[-1])
    assert jnp.allclose(out_med, ref_med, atol=3e-2, rtol=3e-2), "multi-tile mismatch"

    print("KERNEL_OK")
</pallas_src>

<mosaic_0001>
module attributes {stable_mosaic.version = 11 : i64} {
  func.func @kernel(%arg0: i32, %arg1: memref<8x256xbf16, #tpu.memory_space<vmem>>, %arg2: memref<256x512xbf16, #tpu.memory_space<vmem>>, %arg3: memref<512x256xbf16, #tpu.memory_space<vmem>>, %arg4: memref<256x128xbf16, #tpu.memory_space<vmem>>, %arg5: memref<1x512xf32, #tpu.memory_space<vmem>>, %arg6: memref<1x256xf32, #tpu.memory_space<vmem>>, %arg7: memref<1x128xf32, #tpu.memory_space<vmem>>, %arg8: memref<8x128xf32, #tpu.memory_space<vmem>>) attributes {dimension_semantics = [#tpu.dimension_semantics<parallel>], iteration_bounds = array<i64: 1>, scalar_prefetch = 0 : i64, scratch_operands = 0 : i64, tpu.core_type = #tpu.core_type<tc>, window_params = [{transform_indices = @transform_0, window_bounds = array<i64: 8, 256>}, {pipeline_mode = #tpu.pipeline_mode<synchronous>, transform_indices = @transform_1, window_bounds = array<i64: 256, 512>}, {pipeline_mode = #tpu.pipeline_mode<synchronous>, transform_indices = @transform_2, window_bounds = array<i64: 512, 256>}, {pipeline_mode = #tpu.pipeline_mode<synchronous>, transform_indices = @transform_3, window_bounds = array<i64: 256, 128>}, {pipeline_mode = #tpu.pipeline_mode<synchronous>, transform_indices = @transform_4, window_bounds = array<i64: 1, 512>}, {pipeline_mode = #tpu.pipeline_mode<synchronous>, transform_indices = @transform_5, window_bounds = array<i64: 1, 256>}, {pipeline_mode = #tpu.pipeline_mode<synchronous>, transform_indices = @transform_6, window_bounds = array<i64: 1, 128>}, {transform_indices = @transform_7, window_bounds = array<i64: 8, 128>}]} {
    %c0 = arith.constant 0 : index
    %c0_0 = arith.constant 0 : index
    %0 = vector.load %arg1[%c0, %c0_0] : memref<8x256xbf16, #tpu.memory_space<vmem>>, vector<8x256xbf16>
    %c0_1 = arith.constant 0 : index
    %c0_2 = arith.constant 0 : index
    %1 = vector.load %arg2[%c0_1, %c0_2] : memref<256x512xbf16, #tpu.memory_space<vmem>>, vector<256x512xbf16>
    %cst = arith.constant dense<0.000000e+00> : vector<8x512xf32>
    %2 = tpu.matmul %0, %1, %cst {dimension_numbers = #tpu.dot_dimension_numbers<[1], [0], [0], [1], [0, 0, 1, 1], [], []>} : vector<8x256xbf16>, vector<256x512xbf16>, vector<8x512xf32> -> vector<8x512xf32>
    %3 = math.tanh %2 : vector<8x512xf32>
    %c0_3 = arith.constant 0 : index
    %c0_4 = arith.constant 0 : index
    %4 = vector.load %arg5[%c0_3, %c0_4] : memref<1x512xf32, #tpu.memory_space<vmem>>, vector<1x512xf32>
    %5 = vector.broadcast %4 : vector<1x512xf32> to vector<8x512xf32>
    %6 = arith.addf %3, %5 : vector<8x512xf32>
    %c0_5 = arith.constant 0 : index
    %c0_6 = arith.constant 0 : index
    %7 = vector.load %arg3[%c0_5, %c0_6] : memref<512x256xbf16, #tpu.memory_space<vmem>>, vector<512x256xbf16>
    %8 = arith.truncf %6 : vector<8x512xf32> to vector<8x512xbf16>
    %cst_7 = arith.constant dense<0.000000e+00> : vector<8x256xf32>
    %9 = tpu.matmul %8, %7, %cst_7 {dimension_numbers = #tpu.dot_dimension_numbers<[1], [0], [0], [1], [0, 0, 1, 1], [], []>} : vector<8x512xbf16>, vector<512x256xbf16>, vector<8x256xf32> -> vector<8x256xf32>
    %10 = math.tanh %9 : vector<8x256xf32>
    %c0_8 = arith.constant 0 : index
    %c0_9 = arith.constant 0 : index
    %11 = vector.load %arg6[%c0_8, %c0_9] : memref<1x256xf32, #tpu.memory_space<vmem>>, vector<1x256xf32>
    %12 = vector.broadcast %11 : vector<1x256xf32> to vector<8x256xf32>
    %13 = arith.addf %10, %12 : vector<8x256xf32>
    %c0_10 = arith.constant 0 : index
    %c0_11 = arith.constant 0 : index
    %14 = vector.load %arg4[%c0_10, %c0_11] : memref<256x128xbf16, #tpu.memory_space<vmem>>, vector<256x128xbf16>
    %15 = arith.truncf %13 : vector<8x256xf32> to vector<8x256xbf16>
    %cst_12 = arith.constant dense<0.000000e+00> : vector<8x128xf32>
    %16 = tpu.matmul %15, %14, %cst_12 {dimension_numbers = #tpu.dot_dimension_numbers<[1], [0], [0], [1], [0, 0, 1, 1], [], []>} : vector<8x256xbf16>, vector<256x128xbf16>, vector<8x128xf32> -> vector<8x128xf32>
    %17 = math.tanh %16 : vector<8x128xf32>
    %c0_13 = arith.constant 0 : index
    %c0_14 = arith.constant 0 : index
    %18 = vector.load %arg7[%c0_13, %c0_14] : memref<1x128xf32, #tpu.memory_space<vmem>>, vector<1x128xf32>
    %19 = vector.broadcast %18 : vector<1x128xf32> to vector<8x128xf32>
    %20 = arith.addf %17, %19 : vector<8x128xf32>
    %c0_15 = arith.constant 0 : index
    %c0_16 = arith.constant 0 : index
    %21 = vector.load %arg8[%c0_15, %c0_16] : memref<8x128xf32, #tpu.memory_space<vmem>>, vector<8x128xf32>
    tpu.vector_store %arg8[%c0_15, %c0_16], %20 {strides = array<i32>} : memref<8x128xf32, #tpu.memory_space<vmem>>, vector<8x128xf32>,
    return
  }
  func.func @transform_0(%arg0: i32) -> (i32, i32) {
    %c0_i32 = arith.constant 0 : i32
    %c0_i32_0 = arith.constant 0 : i32
    return %arg0, %c0_i32 : i32, i32
  }
  func.func @transform_1(%arg0: i32) -> (i32, i32) {
    %c0_i32 = arith.constant 0 : i32
    %c0_i32_0 = arith.constant 0 : i32
    %c0_i32_1 = arith.constant 0 : i32
    return %c0_i32, %c0_i32_0 : i32, i32
  }
  func.func @transform_2(%arg0: i32) -> (i32, i32) {
    %c0_i32 = arith.constant 0 : i32
    %c0_i32_0 = arith.constant 0 : i32
    %c0_i32_1 = arith.constant 0 : i32
    return %c0_i32, %c0_i32_0 : i32, i32
  }
  func.func @transform_3(%arg0: i32) -> (i32, i32) {
    %c0_i32 = arith.constant 0 : i32
    %c0_i32_0 = arith.constant 0 : i32
    %c0_i32_1 = arith.constant 0 : i32
    return %c0_i32, %c0_i32_0 : i32, i32
  }
  func.func @transform_4(%arg0: i32) -> (i32, i32) {
    %c0_i32 = arith.constant 0 : i32
    %c0_i32_0 = arith.constant 0 : i32
    %c0_i32_1 = arith.constant 0 : i32
    return %c0_i32, %c0_i32_0 : i32, i32
  }
  func.func @transform_5(%arg0: i32) -> (i32, i32) {
    %c0_i32 = arith.constant 0 : i32
    %c0_i32_0 = arith.constant 0 : i32
    %c0_i32_1 = arith.constant 0 : i32
    return %c0_i32, %c0_i32_0 : i32, i32
  }
  func.func @transform_6(%arg0: i32) -> (i32, i32) {
    %c0_i32 = arith.constant 0 : i32
    %c0_i32_0 = arith.constant 0 : i32
    %c0_i32_1 = arith.constant 0 : i32
    return %c0_i32, %c0_i32_0 : i32, i32
  }
  func.func @transform_7(%arg0: i32) -> (i32, i32) {
    %c0_i32 = arith.constant 0 : i32
    %c0_i32_0 = arith.constant 0 : i32
    return %arg0, %c0_i32 : i32, i32
  }
}

</mosaic_0001>

<bundles_post_ra>
// kernel: tpu_custom_call.1
= control target key start
LH: loop header
LB: loop body
LE: loop exit
PB: predicated region body
PF: predicated region fallthrough
CT: control target
= control target key end

     0   :  { %12 = vsyncpa [#allocation3], 0  ;;  %s1948_s0 = inlined_call_operand.hbm [shape: bf16[8,256], index: 0, kind: input, shape index: {}]   ;;  %s1949_s1 = inlined_call_operand.hbm [shape: bf16[256,512], index: 1, kind: input, shape index: {}]   ;;  %s1950_s2 = inlined_call_operand.hbm [shape: bf16[512,256], index: 2, kind: input, shape index: {}]   ;;  %s1951_s3 = inlined_call_operand.hbm [shape: bf16[256,128], index: 3, kind: input, shape index: {}]   ;;  %s1952_s4 = inlined_call_operand.vmem [shape: f32[1,512], index: 4, kind: input, shape index: {}]   ;;  %s1953_s5 = inlined_call_operand.vmem [shape: f32[1,256], index: 5, kind: input, shape index: {}]   ;;  %s1954_s6 = inlined_call_operand.vmem [shape: f32[1,128], index: 6, kind: input, shape index: {}]   ;;  %s1955_s7 = inlined_call_operand.hbm [shape: f32[8,128], index: 7, kind: output, shape index: {}]  }
   0x1   :  { %13 = vsyncpa [#allocation6], 0 }
   0x2   :  { %14 = vsyncpa [#allocation9], 0 }
   0x3   :  { %15 = vsyncpa [#allocation4], 0  ;;  %s1794_s24 = smov [#allocation5]   ;;  %s1676_s28 = scalar_lea.hbm %s1949_s1, 8192 }
   0x4   :  { %s31_s25 = sshll.u32 %s1794_s24, 4  ;;  %p1677_p0 = scmp.ne.s32.totalorder %s1949_s1, %s1676_s28  ;;  %s32_s25 = int_to_ptr.vmem [resolvable:$true] %s31_s25 }
   0x5   :  { %p1680_p1 = scmp.lt.u32.totalorder %s1676_s28, %s1949_s1 }
   0x7   :  { %p1682_p2 = pnand %p1680_p1, %p1677_p0 }
   0x9   :  { %1685 = shalt.err (!%p1682_p2)
}
   0xa   :  { %s1686_s10 = scalar_lea.vmem %s32_s25, 8192  ;;  %p1691_p4 = scmp.lt.s32.totalorder %s32_s25, %s32_s25 }
   0xb   :  { %p1687_p3 = scmp.ne.s32.totalorder %s32_s25, %s1686_s10  ;;  %p1692_p5 = scmp.lt.s32.totalorder %s1686_s10, %s1686_s10 }
   0xd   :  { %p1693_p6 = por %p1692_p5, %p1691_p4 }
   0xf   :  { %p1694_p7 = pnand %p1693_p6, %p1687_p3 }
  0x11   :  { %1697 = shalt.err (!%p1694_p7)
}
  0x12   :  { %s1795_s11 = smov 256   ;;  %s1796_s12 = smov 16  }
  0x13   :  { %37 = dma.hbm_to_vmem [thread:$0]  %s1949_s1, 8192, %s32_s25, [#allocation6], %s1795_s11, %s1795_s11, %s1796_s12  }
  0x14   :  { %s1797_s15 = smov [#allocation2]   ;;  %s1798_s17 = smov [#allocation7]  }
  0x15   :  { %s22_s16 = sshll.u32 %s1797_s15, 4  ;;  %s43_s18 = sshll.u32 %s1798_s17, 4  ;;  %s23_s16 = int_to_ptr.vmem [resolvable:$true] %s22_s16  ;;  %s44_s18 = int_to_ptr.vmem [resolvable:$true] %s43_s18 }
  0x16   :  { %s1698_s21 = scalar_lea.hbm %s1948_s0, 128 }
  0x17   :  { %p1699_p8 = scmp.ne.s32.totalorder %s1948_s0, %s1698_s21  ;;  %p1702_p9 = scmp.lt.u32.totalorder %s1698_s21, %s1948_s0 }
  0x19   :  { %p1704_p10 = pnand %p1702_p9, %p1699_p8 }
  0x1b   :  { %1707 = shalt.err (!%p1704_p10)
}
  0x1c   :  { %s1708_s1 = scalar_lea.vmem %s23_s16, 128  ;;  %p1713_p12 = scmp.lt.s32.totalorder %s23_s16, %s23_s16 }
  0x1d   :  { %p1709_p11 = scmp.ne.s32.totalorder %s23_s16, %s1708_s1  ;;  %p1714_p13 = scmp.lt.s32.totalorder %s1708_s1, %s1708_s1 }
  0x1f   :  { %p1715_p0 = por %p1714_p13, %p1713_p12 }
  0x21   :  { %p1716_p1 = pnand %p1715_p0, %p1709_p11 }
  0x23   :  { %1719 = shalt.err (!%p1716_p1)
}
  0x24   :  { %25 = dma.hbm_to_vmem [thread:$0]  %s1948_s0, 128, %s23_s16, [#allocation3]  }
  0x25   :  { %s1720_s30 = scalar_lea.hbm %s1950_s2, 8192 }
  0x26   :  { %p1721_p2 = scmp.ne.s32.totalorder %s1950_s2, %s1720_s30  ;;  %p1724_p3 = scmp.lt.u32.totalorder %s1720_s30, %s1950_s2 }
  0x28   :  { %p1726_p4 = pnand %p1724_p3, %p1721_p2 }
  0x2a   :  { %1729 = shalt.err (!%p1726_p4)
}
  0x2b   :  { %s1730_s12 = scalar_lea.vmem %s44_s18, 8192  ;;  %p1735_p6 = scmp.lt.s32.totalorder %s44_s18, %s44_s18 }
  0x2c   :  { %p1731_p5 = scmp.ne.s32.totalorder %s44_s18, %s1730_s12  ;;  %p1736_p7 = scmp.lt.s32.totalorder %s1730_s12, %s1730_s12 }
  0x2e   :  { %p1737_p8 = por %p1736_p7, %p1735_p6 }
  0x30   :  { %p1738_p9 = pnand %p1737_p8, %p1731_p5 }
  0x32   :  { %1741 = shalt.err (!%p1738_p9)
}
  0x33   :  { %s1799_s0 = smov 128   ;;  %s1800_s13 = smov 8  }
  0x34   :  { %49 = dma.hbm_to_vmem [thread:$0]  %s1950_s2, 8192, %s44_s18, [#allocation6], %s1799_s0, %s1799_s0, %s1800_s13  }
  0x35   :  { %s1801_s16 = smov [#allocation8]   ;;  %s1742_s21 = scalar_lea.hbm %s1951_s3, 2048 }
  0x36   :  { %s55_s17 = sshll.u32 %s1801_s16, 4  ;;  %p1743_p10 = scmp.ne.s32.totalorder %s1951_s3, %s1742_s21  ;;  %s56_s17 = int_to_ptr.vmem [resolvable:$true] %s55_s17 }
  0x37   :  { %p1746_p11 = scmp.lt.u32.totalorder %s1742_s21, %s1951_s3 }
  0x39   :  { %p1748_p12 = pnand %p1746_p11, %p1743_p10 }
  0x3b   :  { %1751 = shalt.err (!%p1748_p12)
}
  0x3c   :  { %s1752_s1 = scalar_lea.vmem %s56_s17, 2048  ;;  %p1757_p0 = scmp.lt.s32.totalorder %s56_s17, %s56_s17 }
  0x3d   :  { %p1753_p13 = scmp.ne.s32.totalorder %s56_s17, %s1752_s1  ;;  %p1758_p1 = scmp.lt.s32.totalorder %s1752_s1, %s1752_s1 }
  0x3f   :  { %p1759_p2 = por %p1758_p1, %p1757_p0 }
  0x41   :  { %p1760_p3 = pnand %p1759_p2, %p1753_p13 }
  0x43   :  { %1763 = shalt.err (!%p1760_p3)
}
  0x44   :  { %s1802_s2 = smov 64   ;;  %s1803_s18 = smov 4  }
  0x45   :  { %61 = dma.hbm_to_vmem [thread:$0]  %s1951_s3, 2048, %s56_s17, [#allocation9], %s1802_s2, %s1802_s2, %s1803_s18  }
  0x46   :  { %1786 = dma.done.wait [#allocation3], 128  }
  0x47   :  { %1787 = vsyncadd [#allocation3], 4294967168 }
  0x48   :  { %1788 = dma.done.wait [#allocation6], 16384  }
  0x49   :  { %1789 = vsyncadd [#allocation6], 4294950912 }
  0x4a   :  { %1790 = dma.done.wait [#allocation9], 2048  }
  0x4b   :  { %1791 = vsyncadd [#allocation9], 4294965248  ;;  %v1452_v0 = vld [vmem:[#allocation5 + $0x4] ss:$16 sps:$4 sm:$0xff]   ;;  %v1454_v1 = vld [vmem:[#allocation5] ss:$16 sps:$4 sm:$0xff]  }
  0x4c   :  { %473 = vmatprep.subr.bf16.mxu1 %v1452_v0  ;;  %v1455_v2 = vld [vmem:[#allocation5 + $0x24] ss:$16 sps:$4 sm:$0xff]   ;;  %v1457_v3 = vld [vmem:[#allocation5 + $0x20] ss:$16 sps:$4 sm:$0xff]   ;;  %v1893_v13 = vld [vmem:[#allocation2] sm:$0xff]  ;;  %s1804_s8 = smov [#allocation10]  }
  0x4d   :  { %474 = vmatpush1.bf16.msra.mxu1 %v1454_v1  ;;  %v1458_v4 = vld [vmem:[#allocation5 + $0x44] ss:$16 sps:$4 sm:$0xff]   ;;  %v1460_v5 = vld [vmem:[#allocation5 + $0x40] ss:$16 sps:$4 sm:$0xff]   ;;  %v1897_v14 = vcombine.high %v1893_v13, %v1893_v13  ;;  %v1504_v43 = vld [vmem:[#allocation5 + $0xc] ss:$16 sps:$4 sm:$0xff]   ;;  %v1902_v48 = vcombine.low %v1893_v13, %v1893_v13 }
  0x4e   :  { %475 = vmatprep.subr.bf16.mxu1 %v1455_v2  ;;  %v1461_v6 = vld [vmem:[#allocation5 + $0x64] ss:$16 sps:$4 sm:$0xff]   ;;  %v1463_v7 = vld [vmem:[#allocation5 + $0x60] ss:$16 sps:$4 sm:$0xff]   ;;  %v1502_v47 = vld [vmem:[#allocation5 + $0x8] ss:$16 sps:$4 sm:$0xff]  }
  0x4f   :  { %v1464_v8 = vld [vmem:[#allocation5 + $0x84] ss:$16 sps:$4 sm:$0xff]   ;;  %v1466_v9 = vld [vmem:[#allocation5 + $0x80] ss:$16 sps:$4 sm:$0xff]   ;;  %505 = vmatprep.mubr.bf16.mxu1 %v1897_v14  ;;  %v1507_v49 = vld [vmem:[#allocation5 + $0x2c] ss:$16 sps:$4 sm:$0xff]  }
  0x50   :  { %v1467_v10 = vld [vmem:[#allocation5 + $0xa4] ss:$16 sps:$4 sm:$0xff]   ;;  %v1469_v11 = vld [vmem:[#allocation5 + $0xa0] ss:$16 sps:$4 sm:$0xff]   ;;  %v1505_v52 = vld [vmem:[#allocation5 + $0x28] ss:$16 sps:$4 sm:$0xff]  }
  0x51   :  { %476 = vmatpush1.bf16.msra.mxu1 %v1457_v3  ;;  %v1470_v12 = vld [vmem:[#allocation5 + $0xc4] ss:$16 sps:$4 sm:$0xff]   ;;  %v1472_v15 = vld [vmem:[#allocation5 + $0xc0] ss:$16 sps:$4 sm:$0xff]   ;;  %v1510_v54 = vld [vmem:[#allocation5 + $0x4c] ss:$16 sps:$4 sm:$0xff]  }
  0x52   :  { %477 = vmatprep.subr.bf16.mxu1 %v1458_v4  ;;  %v1473_v16 = vld [vmem:[#allocation5 + $0xe4] ss:$16 sps:$4 sm:$0xff]   ;;  %v1475_v17 = vld [vmem:[#allocation5 + $0xe0] ss:$16 sps:$4 sm:$0xff]   ;;  %v1508_v56 = vld [vmem:[#allocation5 + $0x48] ss:$16 sps:$4 sm:$0xff]  }
  0x53   :  { %v1476_v18 = vld [vmem:[#allocation5 + $0x104] ss:$16 sps:$4 sm:$0xff]   ;;  %v1478_v19 = vld [vmem:[#allocation5 + $0x100] ss:$16 sps:$4 sm:$0xff]   ;;  %v1513_v58 = vld [vmem:[#allocation5 + $0x6c] ss:$16 sps:$4 sm:$0xff]  }
  0x54   :  { %v1479_v20 = vld [vmem:[#allocation5 + $0x124] ss:$16 sps:$4 sm:$0xff]   ;;  %v1481_v21 = vld [vmem:[#allocation5 + $0x120] ss:$16 sps:$4 sm:$0xff]   ;;  %v1511_v60 = vld [vmem:[#allocation5 + $0x68] ss:$16 sps:$4 sm:$0xff]  }
  0x55   :  { %478 = vmatpush1.bf16.msra.mxu1 %v1460_v5  ;;  %v1482_v22 = vld [vmem:[#allocation5 + $0x144] ss:$16 sps:$4 sm:$0xff]   ;;  %v1484_v23 = vld [vmem:[#allocation5 + $0x140] ss:$16 sps:$4 sm:$0xff]   ;;  %v1516_v62 = vld [vmem:[#allocation5 + $0x8c] ss:$16 sps:$4 sm:$0xff]  }
  0x56   :  { %479 = vmatprep.subr.bf16.mxu1 %v1461_v6  ;;  %v1485_v24 = vld [vmem:[#allocation5 + $0x164] ss:$16 sps:$4 sm:$0xff]   ;;  %v1487_v25 = vld [vmem:[#allocation5 + $0x160] ss:$16 sps:$4 sm:$0xff]   ;;  %v1514_v0 = vld [vmem:[#allocation5 + $0x88] ss:$16 sps:$4 sm:$0xff]  }
  0x57   :  { %v1488_v26 = vld [vmem:[#allocation5 + $0x184] ss:$16 sps:$4 sm:$0xff]   ;;  %v1552_v28 = vld [vmem:[#allocation7] ss:$8 sps:$4 sm:$0xff]   ;;  %v1555_v31 = vld [vmem:[#allocation7 + $0x10] ss:$8 sps:$4 sm:$0xff]  }
  0x58   :  { %v1550_v27 = vld [vmem:[#allocation7 + $0x4] ss:$8 sps:$4 sm:$0xff]   ;;  %v1553_v29 = vld [vmem:[#allocation7 + $0x14] ss:$8 sps:$4 sm:$0xff]   ;;  %v1490_v30 = vld [vmem:[#allocation5 + $0x180] ss:$16 sps:$4 sm:$0xff]  }
  0x59   :  { %480 = vmatpush1.bf16.msra.mxu1 %v1463_v7  ;;  %973 = vmatprep.subr.bf16.mxu0 %v1550_v27  ;;  %v1556_v32 = vld [vmem:[#allocation7 + $0x24] ss:$8 sps:$4 sm:$0xff]   ;;  %v1493_v34 = vld [vmem:[#allocation5 + $0x1a0] ss:$16 sps:$4 sm:$0xff]   ;;  %v1559_v36 = vld [vmem:[#allocation7 + $0x34] ss:$8 sps:$4 sm:$0xff]  }
  0x5a   :  { %481 = vmatprep.subr.bf16.mxu1 %v1464_v8  ;;  %974 = vmatpush1.bf16.msra.mxu0 %v1552_v28  ;;  %v1491_v33 = vld [vmem:[#allocation5 + $0x1a4] ss:$16 sps:$4 sm:$0xff]   ;;  %v1558_v35 = vld [vmem:[#allocation7 + $0x20] ss:$8 sps:$4 sm:$0xff]   ;;  %v1561_v39 = vld [vmem:[#allocation7 + $0x30] ss:$8 sps:$4 sm:$0xff]  }
  0x5b   :  { %975 = vmatprep.subr.bf16.mxu0 %v1553_v29  ;;  %v1494_v37 = vld [vmem:[#allocation5 + $0x1c4] ss:$16 sps:$4 sm:$0xff]   ;;  %v1496_v38 = vld [vmem:[#allocation5 + $0x1c0] ss:$16 sps:$4 sm:$0xff]   ;;  %v1519_v2 = vld [vmem:[#allocation5 + $0xac] ss:$16 sps:$4 sm:$0xff]  }
  0x5c   :  { %v1562_v40 = vld [vmem:[#allocation7 + $0x44] ss:$8 sps:$4 sm:$0xff]   ;;  %v1499_v42 = vld [vmem:[#allocation5 + $0x1e0] ss:$16 sps:$4 sm:$0xff]   ;;  %v1565_v45 = vld [vmem:[#allocation7 + $0x54] ss:$8 sps:$4 sm:$0xff]  }
  0x5d   :  { %482 = vmatpush1.bf16.msra.mxu1 %v1466_v9  ;;  %v1497_v41 = vld [vmem:[#allocation5 + $0x1e4] ss:$16 sps:$4 sm:$0xff]   ;;  %v1564_v44 = vld [vmem:[#allocation7 + $0x40] ss:$8 sps:$4 sm:$0xff]   ;;  %v1567_v46 = vld [vmem:[#allocation7 + $0x50] ss:$8 sps:$4 sm:$0xff]  }
  0x5e   :  { %483 = vmatprep.subr.bf16.mxu1 %v1467_v10  ;;  %976 = vmatpush1.bf16.msra.mxu0 %v1555_v31  ;;  %v1568_v50 = vld [vmem:[#allocation7 + $0x64] ss:$8 sps:$4 sm:$0xff]   ;;  %v1570_v51 = vld [vmem:[#allocation7 + $0x60] ss:$8 sps:$4 sm:$0xff]   ;;  %v1571_v53 = vld [vmem:[#allocation7 + $0x74] ss:$8 sps:$4 sm:$0xff]  }
  0x5f   :  { %977 = vmatprep.subr.bf16.mxu0 %v1556_v32  ;;  %v1573_v55 = vld [vmem:[#allocation7 + $0x70] ss:$8 sps:$4 sm:$0xff]   ;;  %v1574_v57 = vld [vmem:[#allocation7 + $0x84] ss:$8 sps:$4 sm:$0xff]   ;;  %v1576_v59 = vld [vmem:[#allocation7 + $0x80] ss:$8 sps:$4 sm:$0xff]  }
  0x60   :  { %v1577_v61 = vld [vmem:[#allocation7 + $0x94] ss:$8 sps:$4 sm:$0xff]   ;;  %v1579_v63 = vld [vmem:[#allocation7 + $0x90] ss:$8 sps:$4 sm:$0xff]   ;;  %v1580_v1 = vld [vmem:[#allocation7 + $0xa4] ss:$8 sps:$4 sm:$0xff]  }
  0x61   :  { %484 = vmatpush1.bf16.msra.mxu1 %v1469_v11  ;;  %v1582_v3 = vld [vmem:[#allocation7 + $0xa0] ss:$8 sps:$4 sm:$0xff]   ;;  %v1583_v5 = vld [vmem:[#allocation7 + $0xb4] ss:$8 sps:$4 sm:$0xff]   ;;  %v1585_v7 = vld [vmem:[#allocation7 + $0xb0] ss:$8 sps:$4 sm:$0xff]  }
  0x62   :  { %485 = vmatprep.subr.bf16.mxu1 %v1470_v12  ;;  %978 = vmatpush1.bf16.msra.mxu0 %v1558_v35  ;;  %v1517_v4 = vld [vmem:[#allocation5 + $0xa8] ss:$16 sps:$4 sm:$0xff]   ;;  %v1522_v6 = vld [vmem:[#allocation5 + $0xcc] ss:$16 sps:$4 sm:$0xff]   ;;  %s1257_s9 = sshll.u32 %s1804_s8, 4  ;;  %s1258_s9 = int_to_ptr.vmem [resolvable:$true] %s1257_s9 }
  0x63   :  { %979 = vmatprep.subr.bf16.mxu0 %v1559_v36  ;;  %v1520_v8 = vld [vmem:[#allocation5 + $0xc8] ss:$16 sps:$4 sm:$0xff]   ;;  %v1525_v9 = vld [vmem:[#allocation5 + $0xec] ss:$16 sps:$4 sm:$0xff]   ;;  %v1646_v36 = vld [vmem:[#allocation8 + $0x40] sm:$0xff]   ;;  %s1764_s10 = scalar_lea.vmem %s1258_s9, 128  ;;  %p1769_p5 = scmp.lt.s32.totalorder %s1258_s9, %s1258_s9 }
  0x64   :  { %v1523_v10 = vld [vmem:[#allocation5 + $0xe8] ss:$16 sps:$4 sm:$0xff]   ;;  %v1528_v11 = vld [vmem:[#allocation5 + $0x10c] ss:$16 sps:$4 sm:$0xff]   ;;  %p1765_p4 = scmp.ne.s32.totalorder %s1258_s9, %s1764_s10  ;;  %p1770_p6 = scmp.lt.s32.totalorder %s1764_s10, %s1764_s10 }
  0x65   :  { %486 = vmatpush1.bf16.msra.mxu1 %v1472_v15  ;;  %v1526_v12 = vld [vmem:[#allocation5 + $0x108] ss:$16 sps:$4 sm:$0xff]   ;;  %v1531_v13 = vld [vmem:[#allocation5 + $0x12c] ss:$16 sps:$4 sm:$0xff]  }
  0x66   :  { %487 = vmatprep.subr.bf16.mxu1 %v1473_v16  ;;  %980 = vmatpush1.bf16.msra.mxu0 %v1561_v39  ;;  %v1534_v15 = vld [vmem:[#allocation5 + $0x14c] ss:$16 sps:$4 sm:$0xff]   ;;  %v1532_v16 = vld [vmem:[#allocation5 + $0x148] ss:$16 sps:$4 sm:$0xff]   ;;  %p1771_p7 = por %p1770_p6, %p1769_p5 }
  0x67   :  { %981 = vmatprep.subr.bf16.mxu0 %v1562_v40  ;;  %v1586_v27 = vld [vmem:[#allocation7 + $0xc4] ss:$8 sps:$4 sm:$0xff]   ;;  %v1588_v28 = vld [vmem:[#allocation7 + $0xc0] ss:$8 sps:$4 sm:$0xff]   ;;  %v1589_v29 = vld [vmem:[#allocation7 + $0xd4] ss:$8 sps:$4 sm:$0xff]  }
  0x68   :  { %v1592_v31 = vld [vmem:[#allocation7 + $0xe4] ss:$8 sps:$4 sm:$0xff]   ;;  %v1594_v32 = vld [vmem:[#allocation7 + $0xe0] ss:$8 sps:$4 sm:$0xff]   ;;  %v1650_v40 = vld [vmem:[#allocation8 + $0x50] sm:$0xff]   ;;  %p1772_p8 = pnand %p1771_p7, %p1765_p4 }
  0x69   :  { %488 = vmatpush1.bf16.msra.mxu1 %v1475_v17  ;;  %v1537_v17 = vld [vmem:[#allocation5 + $0x16c] ss:$16 sps:$4 sm:$0xff]  }
  0x6a   :  { %489 = vmatprep.subr.bf16.mxu1 %v1476_v18  ;;  %982 = vmatpush1.bf16.msra.mxu0 %v1564_v44  ;;  %v1535_v18 = vld [vmem:[#allocation5 + $0x168] ss:$16 sps:$4 sm:$0xff]   ;;  %v1600_v35 = vld [vmem:[#allocation7 + $0x104] ss:$8 sps:$4 sm:$0xff]   ;;  %v561_v44 = vlaneseq }
  0x6b   :  { %983 = vmatprep.subr.bf16.mxu0 %v1565_v45  ;;  %v1649_v39 = vld [vmem:[#allocation8 + $0x8] sm:$0xff]  }
  0x6d   :  { %490 = vmatpush1.bf16.msra.mxu1 %v1478_v19  ;;  %v1540_v19 = vld [vmem:[#allocation5 + $0x18c] ss:$16 sps:$4 sm:$0xff]  }
  0x6e   :  { %491 = vmatprep.subr.bf16.mxu1 %v1479_v20  ;;  %984 = vmatpush1.bf16.msra.mxu0 %v1567_v46  ;;  %v1538_v20 = vld [vmem:[#allocation5 + $0x188] ss:$16 sps:$4 sm:$0xff]   ;;  %v1907_v46 = vshrl.u32 %v561_v44, 7 }
  0x6f   :  { %985 = vmatprep.subr.bf16.mxu0 %v1568_v50  ;;  %v1656_v44 = vld [vmem:[#allocation8 + $0x68] sm:$0xff]  }
  0x70   :  { %v563_v50 = vsub.s32 0, %v1907_v46 }
  0x71   :  { %492 = vmatpush1.bf16.msra.mxu1 %v1481_v21  ;;  %v1543_v21 = vld [vmem:[#allocation5 + $0x1ac] ss:$16 sps:$4 sm:$0xff]  }
  0x72   :  { %493 = vmatprep.subr.bf16.mxu1 %v1482_v22  ;;  %986 = vmatpush1.bf16.msra.mxu0 %v1570_v51  ;;  %v1541_v22 = vld [vmem:[#allocation5 + $0x1a8] ss:$16 sps:$4 sm:$0xff]  }
  0x73   :  { %987 = vmatprep.subr.bf16.mxu0 %v1571_v53  ;;  %v1913_v51 = vld [vmem:[%s1952_s4] sm:$0xf] }
  0x74   :  { %v564_v53 = vrot.slane %v1913_v51, %v563_v50 }
  0x75   :  { %494 = vmatpush1.bf16.msra.mxu1 %v1484_v23  ;;  %v1546_v23 = vld [vmem:[#allocation5 + $0x1cc] ss:$16 sps:$4 sm:$0xff]  }
  0x76   :  { %495 = vmatprep.subr.bf16.mxu1 %v1485_v24  ;;  %988 = vmatpush1.bf16.msra.mxu0 %v1573_v55  ;;  %v1544_v24 = vld [vmem:[#allocation5 + $0x1c8] ss:$16 sps:$4 sm:$0xff]  }
  0x77   :  { %989 = vmatprep.subr.bf16.mxu0 %v1574_v57 }
  0x79   :  { %496 = vmatpush1.bf16.msra.mxu1 %v1487_v25  ;;  %v1549_v25 = vld [vmem:[#allocation5 + $0x1ec] ss:$16 sps:$4 sm:$0xff]  }
  0x7a   :  { %497 = vmatprep.subr.bf16.mxu1 %v1488_v26  ;;  %990 = vmatpush1.bf16.msra.mxu0 %v1576_v59  ;;  %v1547_v26 = vld [vmem:[#allocation5 + $0x1e8] ss:$16 sps:$4 sm:$0xff]  }
  0x7b   :  { %991 = vmatprep.subr.bf16.mxu0 %v1577_v61  ;;  %v1598_v61 = vld [vmem:[#allocation7 + $0x100] ss:$8 sps:$4 sm:$0xff]  }
  0x7d   :  { %498 = vmatpush1.bf16.msra.mxu1 %v1490_v30  ;;  %v1591_v30 = vld [vmem:[#allocation7 + $0xd0] ss:$8 sps:$4 sm:$0xff]  }
  0x7e   :  { %499 = vmatprep.subr.bf16.mxu1 %v1491_v33  ;;  %992 = vmatpush1.bf16.msra.mxu0 %v1579_v63  ;;  %v1595_v33 = vld [vmem:[#allocation7 + $0xf4] ss:$8 sps:$4 sm:$0xff]   ;;  %v1601_v63 = vld [vmem:[#allocation7 + $0x110] ss:$8 sps:$4 sm:$0xff]  }
  0x7f   :  { %993 = vmatprep.subr.bf16.mxu0 %v1580_v1  ;;  %v1604_v1 = vld [vmem:[#allocation7 + $0x120] ss:$8 sps:$4 sm:$0xff]  }
  0x81   :  { %500 = vmatpush1.bf16.msra.mxu1 %v1493_v34  ;;  %v1597_v34 = vld [vmem:[#allocation7 + $0xf0] ss:$8 sps:$4 sm:$0xff]  }
  0x82   :  { %501 = vmatprep.subr.bf16.mxu1 %v1494_v37  ;;  %994 = vmatpush1.bf16.msra.mxu0 %v1582_v3  ;;  %v1647_v37 = vld [vmem:[#allocation8] sm:$0xff]   ;;  %v1607_v3 = vld [vmem:[#allocation7 + $0x130] ss:$8 sps:$4 sm:$0xff]  }
  0x83   :  { %995 = vmatprep.subr.bf16.mxu0 %v1583_v5  ;;  %v1610_v5 = vld [vmem:[#allocation7 + $0x140] ss:$8 sps:$4 sm:$0xff]  }
  0x85   :  { %502 = vmatpush1.bf16.msra.mxu1 %v1496_v38  ;;  %v1648_v38 = vld [vmem:[#allocation8 + $0x48] sm:$0xff]  }
  0x86   :  { %503 = vmatprep.subr.bf16.mxu1 %v1497_v41  ;;  %996 = vmatpush1.bf16.msra.mxu0 %v1585_v7  ;;  %v1651_v41 = vld [vmem:[#allocation8 + $0x10] sm:$0xff]  }
  0x87   :  { %997 = vmatprep.subr.bf16.mxu0 %v1586_v27  ;;  %v1613_v7 = vld [vmem:[#allocation7 + $0x150] ss:$8 sps:$4 sm:$0xff]  }
  0x88   :  { %v1637_v27 = vld [vmem:[#allocation7 + $0x1d0] ss:$8 sps:$4 sm:$0xff]  }
  0x89   :  { %504 = vmatpush1.bf16.msra.mxu1 %v1499_v42  ;;  %v1652_v42 = vld [vmem:[#allocation8 + $0x58] sm:$0xff]  }
  0x8a   :  { %514 = vmatprep.subr.bf16.mxu1 %v1504_v43  ;;  %998 = vmatpush1.bf16.msra.mxu0 %v1588_v28  ;;  %v1653_v43 = vld [vmem:[#allocation8 + $0x18] sm:$0xff]   ;;  %v1642_v28 = vld [vmem:[#allocation7 + $0x1e4] ss:$8 sps:$4 sm:$0xff]  }
  0x8b   :  { %999 = vmatprep.subr.bf16.mxu0 %v1589_v29  ;;  %v571_v29 = vsub.s32 2, %v1907_v46 }
  0x8c   :  { %506 = vmatmul.mubr.bf16.vlgmr.msra.gmra.mrb[0].mxu1 %v1902_v48 }
  0x8d   :  { %515 = vmatpush1.bf16.msra.mxu1 %v1502_v47  ;;  %546 = vmatprep.mubr.bf16.mxu1 %v1897_v14  ;;  %v1529_v14 = vld [vmem:[#allocation5 + $0x128] ss:$16 sps:$4 sm:$0xff]  }
  0x8e   :  { %516 = vmatprep.subr.bf16.mxu1 %v1507_v49  ;;  %1000 = vmatpush1.bf16.msra.mxu0 %v1591_v30  ;;  %v575_v30 = vsub.s32 3, %v1907_v46 }
  0x8f   :  { %1001 = vmatprep.subr.bf16.mxu0 %v1592_v31  ;;  %v1640_v31 = vld [vmem:[#allocation7 + $0x1e0] ss:$8 sps:$4 sm:$0xff]  }
  0x91   :  { %517 = vmatpush1.bf16.msra.mxu1 %v1505_v52  ;;  %v567_v52 = vsub.s32 1, %v1907_v46 }
  0x92   :  { %518 = vmatprep.subr.bf16.mxu1 %v1510_v54  ;;  %1002 = vmatpush1.bf16.msra.mxu0 %v1594_v32  ;;  %v1645_v32 = vld [vmem:[#allocation7 + $0x1f4] ss:$8 sps:$4 sm:$0xff]  }
  0x93   :  { %1003 = vmatprep.subr.bf16.mxu0 %v1595_v33  ;;  %v568_v54 = vrot.slane %v1913_v51, %v567_v52  ;;  %v572_v33 = vrot.slane %v1913_v51, %v571_v29 }
  0x95   :  { %519 = vmatpush1.bf16.msra.mxu1 %v1508_v56 }
  0x96   :  { %520 = vmatprep.subr.bf16.mxu1 %v1513_v58  ;;  %1004 = vmatpush1.bf16.msra.mxu0 %v1597_v34  ;;  %v576_v34 = vrot.slane %v1913_v51, %v575_v30  ;;  %v1661_v51 = vld [vmem:[#allocation8 + $0x38] sm:$0xff]  }
  0x97   :  { %1014 = vmatprep.subr.bf16.mxu0 %v1600_v35 }
  0x99   :  { %521 = vmatpush1.bf16.msra.mxu1 %v1511_v60 }
  0x9a   :  { %522 = vmatprep.subr.bf16.mxu1 %v1516_v62  ;;  %v1603_v62 = vld [vmem:[#allocation7 + $0x114] ss:$8 sps:$4 sm:$0xff]  }
  0x9d   :  { %523 = vmatpush1.bf16.msra.mxu1 %v1514_v0  ;;  %v1606_v0 = vld [vmem:[#allocation7 + $0x124] ss:$8 sps:$4 sm:$0xff]  }
  0x9e   :  { %524 = vmatprep.subr.bf16.mxu1 %v1519_v2  ;;  %v1609_v2 = vld [vmem:[#allocation7 + $0x134] ss:$8 sps:$4 sm:$0xff]  }
  0xa1   :  { %525 = vmatpush1.bf16.msra.mxu1 %v1517_v4  ;;  %v1612_v4 = vld [vmem:[#allocation7 + $0x144] ss:$8 sps:$4 sm:$0xff]  }
  0xa2   :  { %526 = vmatprep.subr.bf16.mxu1 %v1522_v6  ;;  %v1615_v6 = vld [vmem:[#allocation7 + $0x154] ss:$8 sps:$4 sm:$0xff]  }
  0xa5   :  { %527 = vmatpush1.bf16.msra.mxu1 %v1520_v8  ;;  %v1618_v8 = vld [vmem:[#allocation7 + $0x164] ss:$8 sps:$4 sm:$0xff]  }
  0xa6   :  { %528 = vmatprep.subr.bf16.mxu1 %v1525_v9  ;;  %v1616_v9 = vld [vmem:[#allocation7 + $0x160] ss:$8 sps:$4 sm:$0xff]  }
  0xa9   :  { %529 = vmatpush1.bf16.msra.mxu1 %v1523_v10  ;;  %v1621_v10 = vld [vmem:[#allocation7 + $0x174] ss:$8 sps:$4 sm:$0xff]  }
  0xaa   :  { %530 = vmatprep.subr.bf16.mxu1 %v1528_v11  ;;  %v1619_v11 = vld [vmem:[#allocation7 + $0x170] ss:$8 sps:$4 sm:$0xff]  }
  0xad   :  { %531 = vmatpush1.bf16.msra.mxu1 %v1526_v12  ;;  %v1624_v12 = vld [vmem:[#allocation7 + $0x184] ss:$8 sps:$4 sm:$0xff]  }
  0xae   :  { %532 = vmatprep.subr.bf16.mxu1 %v1531_v13  ;;  %v1622_v13 = vld [vmem:[#allocation7 + $0x180] ss:$8 sps:$4 sm:$0xff]  }
  0xb1   :  { %533 = vmatpush1.bf16.msra.mxu1 %v1529_v14  ;;  %v1627_v14 = vld [vmem:[#allocation7 + $0x194] ss:$8 sps:$4 sm:$0xff]  }
  0xb2   :  { %534 = vmatprep.subr.bf16.mxu1 %v1534_v15  ;;  %v1625_v15 = vld [vmem:[#allocation7 + $0x190] ss:$8 sps:$4 sm:$0xff]  }
  0xb5   :  { %535 = vmatpush1.bf16.msra.mxu1 %v1532_v16  ;;  %v1630_v16 = vld [vmem:[#allocation7 + $0x1a4] ss:$8 sps:$4 sm:$0xff]  }
  0xb6   :  { %536 = vmatprep.subr.bf16.mxu1 %v1537_v17  ;;  %v1628_v17 = vld [vmem:[#allocation7 + $0x1a0] ss:$8 sps:$4 sm:$0xff]  }
  0xb9   :  { %537 = vmatpush1.bf16.msra.mxu1 %v1535_v18  ;;  %v1633_v18 = vld [vmem:[#allocation7 + $0x1b4] ss:$8 sps:$4 sm:$0xff]  }
  0xba   :  { %538 = vmatprep.subr.bf16.mxu1 %v1540_v19  ;;  %v1631_v19 = vld [vmem:[#allocation7 + $0x1b0] ss:$8 sps:$4 sm:$0xff]  }
  0xbd   :  { %539 = vmatpush1.bf16.msra.mxu1 %v1538_v20  ;;  %v1636_v20 = vld [vmem:[#allocation7 + $0x1c4] ss:$8 sps:$4 sm:$0xff]  }
  0xbe   :  { %540 = vmatprep.subr.bf16.mxu1 %v1543_v21  ;;  %v1634_v21 = vld [vmem:[#allocation7 + $0x1c0] ss:$8 sps:$4 sm:$0xff]  }
  0xc1   :  { %541 = vmatpush1.bf16.msra.mxu1 %v1541_v22 }
  0xc2   :  { %542 = vmatprep.subr.bf16.mxu1 %v1546_v23  ;;  %v1639_v23 = vld [vmem:[#allocation7 + $0x1d4] ss:$8 sps:$4 sm:$0xff]  }
  0xc5   :  { %543 = vmatpush1.bf16.msra.mxu1 %v1544_v24 }
  0xc6   :  { %544 = vmatprep.subr.bf16.mxu1 %v1549_v25 }
  0xc9   :  { %545 = vmatpush1.bf16.msra.mxu1 %v1547_v26 }
  0xca   :  { %1415 = vmatprep.subr.bf16.mxu1 %v1646_v36  ;;  %v1643_v36 = vld [vmem:[#allocation7 + $0x1f0] ss:$8 sps:$4 sm:$0xff]  }
  0xcc   :  { %547 = vmatmul.mubr.bf16.vlgmr.msra.gmra.mrb[4].mxu1 %v1902_v48 }
  0xcd   :  { %1416 = vmatpush3.bf16.msra.mxu1 %v1647_v37 }
  0xce   :  { %1417 = vmatprep.subr.bf16.mxu1 %v1648_v38 }
  0xd1   :  { %1418 = vmatpush3.bf16.msra.mxu1 %v1649_v39 }
  0xd2   :  { %1419 = vmatprep.subr.bf16.mxu1 %v1650_v40 }
  0xd5   :  { %1420 = vmatpush3.bf16.msra.mxu1 %v1651_v41 }
  0xd6   :  { %1421 = vmatprep.subr.bf16.mxu1 %v1652_v42  ;;  %v1654_v42 = vld [vmem:[#allocation8 + $0x60] sm:$0xff]  }
  0xd9   :  { %1422 = vmatpush3.bf16.msra.mxu1 %v1653_v43  ;;  %v1655_v43 = vld [vmem:[#allocation8 + $0x20] sm:$0xff]  }
  0xda   :  { %1423 = vmatprep.subr.bf16.mxu1 %v1654_v42 }
  0xdd   :  { %1424 = vmatpush3.bf16.msra.mxu1 %v1655_v43 }
  0xde   :  { %1425 = vmatprep.subr.bf16.mxu1 %v1656_v44 }
 0x15f   :  { %v507_v45 = vpop.f32.mrb[0].mxu1 }
 0x160   :  { %1662 = vtanh.f32 %v507_v45  ;;  %v509_v47 = vpop.f32.mrb[1].mxu1  ;;  %v1657_v45 = vld [vmem:[#allocation8 + $0x28] sm:$0xff]  }
 0x161   :  { %1664 = vtanh.f32 %v509_v47  ;;  %v511_v48 = vpop.f32.mrb[2].mxu1  ;;  %v1658_v47 = vld [vmem:[#allocation8 + $0x70] sm:$0xff]   ;;  %1426 = vmatpush3.bf16.msra.mxu1 %v1657_v45 }
 0x162   :  { %v512_v49 = vpop.f32.mrb[3].mxu1  ;;  %v1659_v48 = vld [vmem:[#allocation8 + $0x30] sm:$0xff]   ;;  %1427 = vmatprep.subr.bf16.mxu1 %v1658_v47 }
 0x163   :  { %v1660_v49 = vld [vmem:[#allocation8 + $0x78] sm:$0xff]  }
 0x165   :  { %1428 = vmatpush3.bf16.msra.mxu1 %v1659_v48 }
 0x166   :  { %1429 = vmatprep.subr.bf16.mxu1 %v1660_v49 }
 0x169   :  { %1430 = vmatpush3.bf16.msra.mxu1 %v1661_v51 }
 0x16a   :  { %v1663_v55 = vpop.eup %1662 }
 0x16b   :  { %v1665_v56 = vpop.eup %1664  ;;  %v581_v57 = vadd.f32 %v1663_v55, %v564_v53 }
 0x16c   :  { %v582_v58 = vadd.f32 %v1665_v56, %v568_v54 }
 0x16d   :  { %v649_v59 = vpack.c.bf16 %v581_v57, %v581_v57  ;;  %v1057_v57 = vld [vmem:[%s1953_s5] sm:$0x3] }
 0x16e   :  { %v650_v60 = vpack.c.bf16 %v582_v58, %v582_v58  ;;  %v1062_v58 = vrot.slane %v1057_v57, %v563_v50  ;;  %v1414_v50 = vld [vmem:[%s1954_s6] ss:$0 sm:$0xff] }
 0x170   :  { %1005 = vmatprep.mubr.bf16.mxu0 %v650_v60 }
 0x171   :  { %1006 = vmatmul.mubr.bf16.vlgmr.msra.gmra.mrb[0].mxu0 %v649_v59  ;;  %v1066_v59 = vrot.slane %v1057_v57, %v567_v52 }
 0x172   :  { %1015 = vmatpush1.bf16.msra.mxu0 %v1598_v61 }
 0x173   :  { %1016 = vmatprep.subr.bf16.mxu0 %v1603_v62 }
 0x176   :  { %1017 = vmatpush1.bf16.msra.mxu0 %v1601_v63 }
 0x177   :  { %1018 = vmatprep.subr.bf16.mxu0 %v1606_v0 }
 0x17a   :  { %1019 = vmatpush1.bf16.msra.mxu0 %v1604_v1 }
 0x17b   :  { %1020 = vmatprep.subr.bf16.mxu0 %v1609_v2 }
 0x17e   :  { %1021 = vmatpush1.bf16.msra.mxu0 %v1607_v3 }
 0x17f   :  { %1022 = vmatprep.subr.bf16.mxu0 %v1612_v4 }
 0x182   :  { %1023 = vmatpush1.bf16.msra.mxu0 %v1610_v5 }
 0x183   :  { %1024 = vmatprep.subr.bf16.mxu0 %v1615_v6 }
 0x186   :  { %1025 = vmatpush1.bf16.msra.mxu0 %v1613_v7 }
 0x187   :  { %1026 = vmatprep.subr.bf16.mxu0 %v1618_v8 }
 0x18a   :  { %1027 = vmatpush1.bf16.msra.mxu0 %v1616_v9 }
 0x18b   :  { %1028 = vmatprep.subr.bf16.mxu0 %v1621_v10 }
 0x18e   :  { %1029 = vmatpush1.bf16.msra.mxu0 %v1619_v11 }
 0x18f   :  { %1030 = vmatprep.subr.bf16.mxu0 %v1624_v12 }
 0x192   :  { %1031 = vmatpush1.bf16.msra.mxu0 %v1622_v13 }
 0x193   :  { %1032 = vmatprep.subr.bf16.mxu0 %v1627_v14 }
 0x196   :  { %1033 = vmatpush1.bf16.msra.mxu0 %v1625_v15 }
 0x197   :  { %1034 = vmatprep.subr.bf16.mxu0 %v1630_v16 }
 0x19a   :  { %1035 = vmatpush1.bf16.msra.mxu0 %v1628_v17 }
 0x19b   :  { %1036 = vmatprep.subr.bf16.mxu0 %v1633_v18 }
 0x19e   :  { %1037 = vmatpush1.bf16.msra.mxu0 %v1631_v19 }
 0x19f   :  { %v548_v22 = vpop.f32.mrb[4].mxu1  ;;  %1038 = vmatprep.subr.bf16.mxu0 %v1636_v20 }
 0x1a0   :  { %1666 = vtanh.f32 %v548_v22  ;;  %v550_v24 = vpop.f32.mrb[5].mxu1 }
 0x1a1   :  { %1668 = vtanh.f32 %v550_v24  ;;  %v552_v25 = vpop.f32.mrb[6].mxu1 }
 0x1a2   :  { %v553_v26 = vpop.f32.mrb[7].mxu1  ;;  %1039 = vmatpush1.bf16.msra.mxu0 %v1634_v21 }
 0x1a3   :  { %1040 = vmatprep.subr.bf16.mxu0 %v1639_v23 }
 0x1a6   :  { %1041 = vmatpush1.bf16.msra.mxu0 %v1637_v27 }
 0x1a7   :  { %1042 = vmatprep.subr.bf16.mxu0 %v1642_v28 }
 0x1aa   :  { %v1667_v35 = vpop.eup %1666  ;;  %1043 = vmatpush1.bf16.msra.mxu0 %v1640_v31 }
 0x1ab   :  { %v1669_v37 = vpop.eup %1668  ;;  %1044 = vmatprep.subr.bf16.mxu0 %v1645_v32  ;;  %v583_v38 = vadd.f32 %v1667_v35, %v572_v33 }
 0x1ac   :  { %v584_v39 = vadd.f32 %v1669_v37, %v576_v34 }
 0x1ad   :  { %v651_v41 = vpack.c.bf16 %v583_v38, %v583_v38 }
 0x1ae   :  { %1045 = vmatpush1.bf16.msra.mxu0 %v1643_v36  ;;  %v652_v40 = vpack.c.bf16 %v584_v39, %v584_v39 }
 0x1b0   :  { %1046 = vmatprep.mubr.bf16.mxu0 %v652_v40 }
 0x1b1   :  { %1047 = vmatmul.mubr.bf16.vlgmr.msra.gmra.mrb[0].mxu0 %v651_v41 }
 0x284   :  { %v1048_v53 = vpop.f32.mrb[0].mxu0 }
 0x285   :  { %1670 = vtanh.f32 %v1048_v53  ;;  %v1050_v54 = vpop.f32.mrb[1].mxu0 }
 0x286   :  { %1672 = vtanh.f32 %v1050_v54  ;;  %v1052_v55 = vpop.f32.mrb[2].mxu0 }
 0x287   :  { %v1053_v56 = vpop.f32.mrb[3].mxu0 }
 0x28f   :  { %v1671_v60 = vpop.eup %1670 }
 0x290   :  { %v1673_v61 = vpop.eup %1672  ;;  %v1069_v62 = vadd.f32 %v1671_v60, %v1062_v58 }
 0x291   :  { %v1070_v63 = vadd.f32 %v1673_v61, %v1066_v59 }
 0x292   :  { %v1103_v1 = vpack.c.bf16 %v1069_v62, %v1069_v62 }
 0x293   :  { %v1104_v0 = vpack.c.bf16 %v1070_v63, %v1070_v63 }
 0x295   :  { %1233 = vmatprep.mubr.bf16.mxu1 %v1104_v0 }
 0x296   :  { %1234 = vmatmul.mubr.bf16.vlgmr.msra.gmra.mrb[8].mxu1 %v1103_v1 }
 0x369   :  { %v1431_v2 = vpop.f32.mrb[8].mxu1 }
 0x36a   :  { %v1432_v3 = vpop.f32.mrb[9].mxu1 }
 0x36b   :  { %v1433_v4 = vadd.f32 %v1432_v3, %v1431_v2  ;;  %v1434_v5 = vpop.f32.mrb[10].mxu1 }
 0x36c   :  { %v1435_v6 = vpop.f32.mrb[11].mxu1 }
 0x36d   :  { %1674 = vtanh.f32 %v1433_v4 }
 0x377   :  { %v1675_v46 = vpop.eup %1674 }
 0x378   :  { %v1249_v52 = vadd.f32 %v1675_v46, %v1414_v50 }
 0x37a   :  { %1250 = vst [vmem:[#allocation10] sm:$0xff] %v1249_v52 }
 0x37b   :  { %1775 = shalt.err (!%p1772_p8)
}
 0x37c   :  { %s1776_s0 = scalar_lea.hbm %s1955_s7, 128 }
 0x37d   :  { %p1777_p9 = scmp.ne.s32.totalorder %s1955_s7, %s1776_s0  ;;  %p1780_p10 = scmp.lt.u32.totalorder %s1776_s0, %s1955_s7 }
 0x37f   :  { %p1782_p11 = pnand %p1780_p10, %p1777_p9 }
 0x381   :  { %1785 = shalt.err (!%p1782_p11)
}
 0x382   :  { %1260 = dma.vmem_to_hbm [thread:$0]  %s1258_s9, 128, %s1955_s7, [#allocation4]  }
 0x383   :  { %1792 = dma.done.wait [#allocation4], 128  }
 0x384   :  { %1793 = vsyncadd [#allocation4], 4294967168 }
 0x385   :  { %1264 = vsyncpa [#allocation3], 1 }
 0x386   :  { %1265 = vsyncpa [#allocation6], 1 }
 0x387   :  { %1266 = vsyncpa [#allocation9], 1 }
 0x388   :  { %1267 = vsyncpa [#allocation4], 1 }

</bundles_post_ra>
